<compile_context>
chip_gen: v6e
topology: v6e:2x2x1
jax: 0.10.0
libtpu: 0.0.40
codegen_flags: <defaults>
</compile_context>

<pallas_src>
import jax
import jax.numpy as jnp
from jax.experimental import pallas as pl
from jax.experimental.pallas import tpu as pltpu


def _round_up(a, m):
    return ((a + m - 1) // m) * m


def _vmem_capacity_bytes():
    """Physical VMEM of the attached TPU; conservative 64 MiB (v7x) fallback."""
    try:
        return int(pltpu.get_tpu_info().vmem_capacity_bytes)
    except Exception:
        return 64 * 1024 * 1024


def _make_kernel(has_bias, tile_k, k_axis):
    """Kernel bodies: W-tile (tv,tu) @ x-tile (tu,tl) -> (tv,tl), f32 accumulate."""
    if not tile_k:
        if has_bias:
            def kernel(x_ref, w_ref, b_ref, o_ref):
                acc = jnp.dot(w_ref[...], x_ref[...],
                              preferred_element_type=jnp.float32)
                o_ref[...] = (acc + b_ref[...].astype(jnp.float32)).astype(o_ref.dtype)
        else:
            def kernel(x_ref, w_ref, o_ref):
                o_ref[...] = jnp.dot(
                    w_ref[...], x_ref[...],
                    preferred_element_type=jnp.float32).astype(o_ref.dtype)
        return kernel

    # K-tiled path: innermost "arbitrary" k axis, f32 VMEM accumulator.
    if has_bias:
        def kernel(x_ref, w_ref, b_ref, o_ref, acc_ref):
            k = pl.program_id(k_axis)

            @pl.when(k == 0)
            def _():
                acc_ref[...] = jnp.zeros_like(acc_ref)

            acc_ref[...] += jnp.dot(w_ref[...], x_ref[...],
                                    preferred_element_type=jnp.float32)

            @pl.when(k == pl.num_programs(k_axis) - 1)
            def _():
                o_ref[...] = (acc_ref[...] + b_ref[...].astype(jnp.float32)
                              ).astype(o_ref.dtype)
    else:
        def kernel(x_ref, w_ref, o_ref, acc_ref):
            k = pl.program_id(k_axis)

            @pl.when(k == 0)
            def _():
                acc_ref[...] = jnp.zeros_like(acc_ref)

            acc_ref[...] += jnp.dot(w_ref[...], x_ref[...],
                                    preferred_element_type=jnp.float32)

            @pl.when(k == pl.num_programs(k_axis) - 1)
            def _():
                o_ref[...] = acc_ref[...].astype(o_ref.dtype)
    return kernel


def transposed_linear_forward(x, weight, bias=None, *, compute_dtype=None):
    """y[b, v, ...] = sum_u weight[v, u] * x[b, u, ...] + bias[v].

    x:      (B, d_input, *L_axes)
    weight: (d_output, d_input)
    bias:   (d_output,) or None / 0.0
    """
    x = jnp.asarray(x)
    weight = jnp.asarray(weight)
    B, U = x.shape[0], x.shape[1]
    trailing = x.shape[2:]
    V = weight.shape[0]
    assert weight.shape[1] == U, "weight must be (d_output, d_input)"

    L = 1
    for d in trailing:
        L *= d

    has_bias = (bias is not None) and not (isinstance(bias, (int, float)) and bias == 0)

    out_dtype = jnp.dtype(x.dtype)
    cdt = jnp.dtype(compute_dtype) if compute_dtype is not None else jnp.dtype(x.dtype)
    xd = wd = cdt.itemsize
    od = out_dtype.itemsize
    # Sublane quantum for the row-tiled (second-to-last) dims: f32->8, bf16->16.
    sub = max(32 // xd, 32 // od)

    # ---- Per-generation VMEM budgeting ------------------------------------
    cap = _vmem_capacity_bytes()
    budget = int(cap * 0.45)       # working-set target: ~28 MiB v7x, ~57 MiB v5e/v6e
    vmem_limit = int(cap * 0.75)   # explicit scoped limit: ~48 MiB v7x, ~96 MiB v5e/v6e

    # ---- Contraction (U) tiling: only when a full-U x block would dominate --
    tile_k = (2 * U * 128 * xd > budget // 4) and U > 1024
    if tile_k:
        tu = 512                              # multiple of 128 (weight last dim)
        Up = _round_up(U, tu)
    else:
        tu = U                                # whole contraction dim per block
        Up = U
    n_k = Up // tu

    # ---- Output-row (V) tiling / weight residency ---------------------------
    Vp0 = _round_up(V, sub)
    bias_lane_bytes = 128 * 4                 # bias buffer is lane-padded f32

    configs = []                              # (tv, weight_resident)
    if not tile_k:
        configs.append((Vp0, True))
    seen = set()
    for c in (256, 128, sub):
        tv_c = min(Vp0, _round_up(c, sub))
        if tv_c not in seen:
            seen.add(tv_c)
            configs.append((tv_c, False))

    chosen = None
    for tv_c, resident_c in configs:
        if resident_c and Vp0 * Up * wd > budget // 4:
            continue
        Vp_c = Vp0 if resident_c else _round_up(V, tv_c)
        w_bytes = Vp_c * Up * wd if resident_c else 2 * tv_c * tu * wd
        b_bytes = ((1 if resident_c else 2) * tv_c * bias_lane_bytes) if has_bias else 0
        per_lane = 2 * tu * xd + 2 * tv_c * od + (tv_c * 4 if tile_k else 0)
        tl_fit = ((budget - w_bytes - b_bytes) // max(per_lane, 1)) // 128 * 128
        if tl_fit >= 128:
            chosen = (tv_c, resident_c, Vp_c, min(int(tl_fit), 4096))
            break
    if chosen is None:
        tv_c = min(Vp0, sub)
        chosen = (tv_c, False, _round_up(V, tv_c), 128)
    tv, w_resident, Vp, tl_max = chosen
    n_v = Vp // tv

    # ---- Lane (L) tile: multiple of 128, large, small padding waste ---------
    L128 = _round_up(max(L, 1), 128)
    if L128 <= tl_max:
        tl = L128
    else:
        tl = 128
        t = tl_max
        while t >= 256:
            if _round_up(L, t) - L <= max(128, L // 16):
                tl = t
                break
            t -= 128
    Lp = _round_up(max(L, 1), tl)
    n_l = Lp // tl

    # ---- Pad operands (zero padding is exact for the matmul) ---------------
    x2 = x.reshape(B, U, L)
    if x2.dtype != cdt:
        x2 = x2.astype(cdt)
    w2 = weight.astype(cdt) if weight.dtype != cdt else weight
    if Lp != L or Up != U:
        x2 = jnp.pad(x2, ((0, 0), (0, Up - U), (0, Lp - L)))
    if Vp != V or Up != U:
        w2 = jnp.pad(w2, ((0, Vp - V), (0, Up - U)))

    # ---- Grid: leading parallel axis = most iterations (megacore),
    #      j innermost parallel (x stays resident across j), k last (arbitrary).
    sizes = {"b": B, "l": n_l, "j": n_v, "k": n_k}
    order = [name for name, _ in sorted((("b", B), ("l", n_l)), key=lambda t: -t[1])]
    if n_v > 1:
        order.append("j")
    if tile_k:
        order.append("k")
    grid = tuple(sizes[name] for name in order)
    dim_sem = tuple("arbitrary" if name == "k" else "parallel" for name in order)
    k_axis = order.index("k") if tile_k else None

    def _imap(fn):
        def index_map(*gs):
            env = dict(zip(order, gs))
            for name in ("b", "l", "j", "k"):
                env.setdefault(name, 0)
            return fn(env)
        return index_map

    in_specs = [
        # x: squeeze batch -> kernel sees a clean (tu, tl) tile.
        pl.BlockSpec((pl.Squeezed(), tu, tl), _imap(lambda e: (e["b"], e["k"], e["l"]))),
        # weight tile (tv, tu); constant block index when fully resident.
        pl.BlockSpec((tv, tu), _imap(lambda e: (e["j"], e["k"]))),
    ]
    args = [x2, w2]
    if has_bias:
        b2 = jnp.asarray(bias).reshape(V, 1).astype(jnp.float32)
        if Vp != V:
            b2 = jnp.pad(b2, ((0, Vp - V), (0, 0)))
        in_specs.append(pl.BlockSpec((tv, 1), _imap(lambda e: (e["j"], 0))))
        args.append(b2)

    out_specs = pl.BlockSpec((pl.Squeezed(), tv, tl),
                             _imap(lambda e: (e["b"], e["j"], e["l"])))
    scratch_shapes = [pltpu.VMEM((tv, tl), jnp.float32)] if tile_k else []

    kernel = _make_kernel(has_bias, tile_k, k_axis)

    out = pl.pallas_call(
        kernel,
        out_shape=jax.ShapeDtypeStruct((B, Vp, Lp), out_dtype),
        grid=grid,
        in_specs=in_specs,
        out_specs=out_specs,
        scratch_shapes=scratch_shapes,
        compiler_params=pltpu.CompilerParams(
            dimension_semantics=dim_sem,
            vmem_limit_bytes=vmem_limit,
        ),
    )(*args)

    out = out[:, :V, :L]
    return out.reshape((B, V) + trailing)


if __name__ == "__main__":
    # Shapes consistent with the module: x is (B, d_input, *L_axes).
    B, d_input, d_output = 2, 32, 64
    trailing = (8, 16)  # flattened to L = 128 lanes inside the kernel

    key = jax.random.PRNGKey(0)
    kx, kw, kb = jax.random.split(key, 3)

    x = jax.random.normal(kx, (B, d_input) + trailing, dtype=jnp.float32)
    # kaiming_uniform_(a=sqrt(5)) on (d_output, d_input) ~ U(-1/sqrt(d_input), +1/sqrt(d_input));
    # the bias init uses the same bound.
    bound = 1.0 / (d_input ** 0.5)
    weight = jax.random.uniform(
        kw, (d_output, d_input), dtype=jnp.float32, minval=-bound, maxval=bound
    )
    bias = jax.random.uniform(
        kb, (d_output,), dtype=jnp.float32, minval=-bound, maxval=bound
    )

    y = transposed_linear_forward(x, weight, bias)
    y = jax.block_until_ready(y)

    # Reference: contract('b u ..., v u -> b v ...', x, W) + bias.view(-1, 1, 1)
    ref = jnp.einsum("bu...,vu->bv...", x, weight) + bias.reshape(-1, 1, 1)

    assert y.shape == (B, d_output) + trailing
    assert y.dtype == x.dtype
    assert jnp.allclose(y, ref, atol=1e-4, rtol=1e-4)

    # Exercise the bias=False path of the module as well.
    y_nb = transposed_linear_forward(x, weight, None)
    y_nb = jax.block_until_ready(y_nb)
    ref_nb = jnp.einsum("bu...,vu->bv...", x, weight)
    assert jnp.allclose(y_nb, ref_nb, atol=1e-4, rtol=1e-4)

    print("KERNEL_OK")
</pallas_src>

<mosaic_0001>
module attributes {stable_mosaic.version = 11 : i64} {
  func.func @kernel(%arg0: i32, %arg1: i32, %arg2: memref<1x32x128xf32, #tpu.memory_space<vmem>>, %arg3: memref<64x32xf32, #tpu.memory_space<vmem>>, %arg4: memref<64x1xf32, #tpu.memory_space<vmem>>, %arg5: memref<1x64x128xf32, #tpu.memory_space<vmem>>) attributes {dimension_semantics = [#tpu.dimension_semantics<parallel>, #tpu.dimension_semantics<parallel>], iteration_bounds = array<i64: 2, 1>, scalar_prefetch = 0 : i64, scratch_operands = 0 : i64, tpu.core_type = #tpu.core_type<tc>, window_params = [{transform_indices = @transform_0, window_bounds = array<i64: 1, 32, 128>}, {pipeline_mode = #tpu.pipeline_mode<synchronous>, transform_indices = @transform_1, window_bounds = array<i64: 64, 32>}, {pipeline_mode = #tpu.pipeline_mode<synchronous>, transform_indices = @transform_2, window_bounds = array<i64: 64, 1>}, {transform_indices = @transform_3, window_bounds = array<i64: 1, 64, 128>}]} {
    %c0 = arith.constant 0 : index
    %c0_0 = arith.constant 0 : index
    %0 = vector.load %arg3[%c0, %c0_0] : memref<64x32xf32, #tpu.memory_space<vmem>>, vector<64x32xf32>
    %c0_1 = arith.constant 0 : index
    %c0_2 = arith.constant 0 : index
    %c0_3 = arith.constant 0 : index
    %1 = vector.load %arg2[%c0_1, %c0_2, %c0_3] : memref<1x32x128xf32, #tpu.memory_space<vmem>>, vector<1x32x128xf32>
    %2 = vector.shape_cast %1 : vector<1x32x128xf32> to vector<32x128xf32>
    %cst = arith.constant dense<0.000000e+00> : vector<64x128xf32>
    %3 = tpu.matmul %0, %2, %cst {dimension_numbers = #tpu.dot_dimension_numbers<[1], [0], [0], [1], [0, 0, 1, 1], [], []>} : vector<64x32xf32>, vector<32x128xf32>, vector<64x128xf32> -> vector<64x128xf32>
    %c0_4 = arith.constant 0 : index
    %c0_5 = arith.constant 0 : index
    %4 = vector.load %arg4[%c0_4, %c0_5] : memref<64x1xf32, #tpu.memory_space<vmem>>, vector<64x1xf32>
    %5 = vector.broadcast %4 : vector<64x1xf32> to vector<64x128xf32>
    %6 = arith.addf %3, %5 : vector<64x128xf32>
    %c0_6 = arith.constant 0 : index
    %c0_7 = arith.constant 0 : index
    %c0_8 = arith.constant 0 : index
    %7 = vector.load %arg5[%c0_6, %c0_7, %c0_8] : memref<1x64x128xf32, #tpu.memory_space<vmem>>, vector<1x64x128xf32>
    %8 = vector.shape_cast %7 : vector<1x64x128xf32> to vector<64x128xf32>
    %9 = vector.shape_cast %6 : vector<64x128xf32> to vector<1x64x128xf32>
    tpu.vector_store %arg5[%c0_6, %c0_7, %c0_8], %9 {strides = array<i32>} : memref<1x64x128xf32, #tpu.memory_space<vmem>>, vector<1x64x128xf32>,
    return
  }
  func.func @transform_0(%arg0: i32, %arg1: i32) -> (i32, i32, i32) {
    %c0_i32 = arith.constant 0 : i32
    %c0_i32_0 = arith.constant 0 : i32
    return %arg0, %c0_i32, %arg1 : i32, i32, i32
  }
  func.func @transform_1(%arg0: i32, %arg1: i32) -> (i32, i32) {
    %c0_i32 = arith.constant 0 : i32
    %c0_i32_0 = arith.constant 0 : i32
    %c0_i32_1 = arith.constant 0 : i32
    return %c0_i32, %c0_i32_0 : i32, i32
  }
  func.func @transform_2(%arg0: i32, %arg1: i32) -> (i32, i32) {
    %c0_i32 = arith.constant 0 : i32
    %c0_i32_0 = arith.constant 0 : i32
    %c0_i32_1 = arith.constant 0 : i32
    return %c0_i32, %c0_i32_0 : i32, i32
  }
  func.func @transform_3(%arg0: i32, %arg1: i32) -> (i32, i32, i32) {
    %c0_i32 = arith.constant 0 : i32
    %c0_i32_0 = arith.constant 0 : i32
    return %arg0, %c0_i32, %arg1 : i32, i32, i32
  }
}

</mosaic_0001>

<bundles_post_ra>
// kernel: tpu_custom_call.1
= control target key start
LH: loop header
LB: loop body
LE: loop exit
PB: predicated region body
PF: predicated region fallthrough
CT: control target
= control target key end

     0   :  { %8 = vsyncpa [#allocation3], 0  ;;  %s884_s0 = inlined_call_operand.vmem [shape: f32[2,32,128], index: 0, kind: input, shape index: {}]   ;;  %s885_s1 = inlined_call_operand.vmem [shape: f32[64,32], index: 1, kind: input, shape index: {}]   ;;  %s886_s2 = inlined_call_operand.vmem [shape: f32[64,1], index: 2, kind: input, shape index: {}]   ;;  %s887_s3 = inlined_call_operand.hbm [shape: f32[2,64,128], index: 3, kind: output, shape index: {}]  }
   0x1   :  { %10 = vsyncpa [#allocation3 + $0x1], 0  ;;  %s710_s12 = smov 0   ;;  %s712_s13 = smov 0  }
   0x2   :  { %s714_s14 = smov 0   ;;  %s716_s15 = smov 0  }
   0x3   :  { %s718_s16 = smov 0   ;;  %s720_s17 = smov 0  }
   0x4 LB: > { %s485_s18 = sadd.s32 4294967295, %s684_s17   ;;  %s486_s19 = sadd.s32 4294967294, %s684_s17   ;;  %s684_s17 = sphi %s720_s17, %s16_s17   ;;  %s680_s16 = sphi %s718_s16, %s894_s16   ;;  %s676_s15 = sphi %s716_s15, %s893_s15   ;;  %s672_s14 = sphi %s714_s14, %s892_s14   ;;  %s668_s13 = sphi %s712_s13, %s891_s13   ;;  %s664_s12 = sphi %s710_s12, %s890_s12  }
   0x5   : > { %s28_s20 = sadd.s32 1, %s680_s16  ;;  %s107_s21 = sadd.s32 1, %s672_s14 }
   0x6   : > { %p30_p0 = scmp.ge.s32.totalorder %s28_s20, 2  ;;  %p117_p1 = scmp.ne.s32.totalorder %s672_s14, %s668_s13 }
   0x7   : > { %p118_p2 = scmp.eq.s32.totalorder %s485_s18, 1  ;;  %p123_p3 = scmp.ne.s32.totalorder %s668_s13, %s664_s12 }
   0x8   : > { %s896_s20 = smov (%p30_p0, %s28_s20), 0  ;;  %p124_p5 = scmp.eq.s32.totalorder %s486_s19, 1 }
   0x9   : > { %p750_p4 = por %p118_p2, %p117_p1  ;;  %s102_s23 = ssub.s32 %s680_s16, %s896_s20 }
   0xa   : > { %p489_p6 = scmp.ge.s32.totalorder %s684_s17, 1  ;;  %p105_p7 = scmp.eq.s32.totalorder %s102_s23, 0 }
   0xb   : > { %p757_p8 = por %p124_p5, %p123_p3  ;;  %p159_p9 = scmp.lt.s32.totalorder %s684_s17, 3 }
   0xc   : > { %s763_s25 = scalar_select %p105_p7, %s672_s14, %s107_s21  }
   0xd   : > { %p160_p10 = pnand %p489_p6, %p159_p9 }
   0xe   : > { %p186_p11 = scmp.lt.s32.totalorder (!%p160_p10), %s676_s15, 1  ;;  %s183_s29 = sand.u32 (!%p160_p10), 1, %s668_s13  }
   0xf   : > { %163 = sbr.rel (%p160_p10) target bundleno = 248 (0xf8), region = 32  ;;  %s507_s5 = sshll.u32 (!%p160_p10), %s676_s15, 10 }
  0x10   : > { %s833_s9 = scalar_lea.hbm (!%p160_p10), %s887_s3, %s507_s5 }
  0x14   : > { %v194_v0 = vld [vmem:[%s885_s1] sm:$0xff]  ;;  %vm254_vm0 = vcmask 261120   ;;  %s187_s30 = scalar_select %p186_p11, %s676_s15, 1  ;;  %v686_v2 = vmov 0   ;;  %v208_v3 = vld [vmem:[%s886_s2 + $0x10] sm:$0xff]  ;;  %v195_v9 = vld [vmem:[%s885_s1 + $0x8] sm:$0xff] }
  0x15   : > { %v198_v1 = vld [vmem:[%s885_s1 + $0x20] sm:$0xff]  ;;  %528 = vmatprep.mubr.msk.f32.mxu0 %vm254_vm0, %v194_v0  ;;  %607 = vset.pattern.permute.xlu1 %v686_v2  ;;  %v199_v10 = vld [vmem:[%s885_s1 + $0x28] sm:$0xff]  ;;  %v196_v11 = vld [vmem:[%s885_s1 + $0x10] sm:$0xff]  ;;  %s839_s15 = scalar_lea.sflag [#allocation3], %s183_s29 }
  0x16   : > { %534 = vmatprep.mubr.msk.f32.mxu1 %vm254_vm0, %v198_v1  ;;  %606 = vset.pattern.permute.xlu0 %v686_v2  ;;  %v206_v4 = vld [vmem:[%s886_s2] sm:$0xff]  ;;  %s506_s8 = sshll.u32 %s187_s30, 5  ;;  %v200_v12 = vld [vmem:[%s885_s1 + $0x30] sm:$0xff]  ;;  %v209_v13 = vld [vmem:[%s886_s2 + $0x18] sm:$0xff]  ;;  %s490_s30 = sshll.u32 %s183_s29, 6 }
  0x17   : > { %226 = vperm.xlu1 %607, %v208_v3   ;;  %216 = vperm.xlu0 %606, %v206_v4   ;;  %s193_s11 = scalar_lea.vmem %s884_s0, %s506_s8  ;;  %v207_v14 = vld [vmem:[%s886_s2 + $0x8] sm:$0xff]  ;;  %v197_v15 = vld [vmem:[%s885_s1 + $0x18] sm:$0xff]  ;;  %v210_v18 = vld [vmem:[%s886_s2 + $0x20] sm:$0xff]  ;;  %s185_s4 = scalar_lea.vmem [#allocation2], %s490_s30 }
  0x18   : > { %v205_v5 = vld [vmem:[%s193_s11 + $0x18] sm:$0xff]  ;;  %v204_v6 = vld [vmem:[%s193_s11 + $0x10] sm:$0xff]  ;;  %v203_v7 = vld [vmem:[%s193_s11 + $0x8] sm:$0xff]  ;;  %s407_s6 = sshll.u32 %s185_s4, 4  ;;  %s835_s6 = int_to_ptr.vmem [resolvable:$true] %s407_s6 }
  0x19   : > { %520 = vmatprep.subr.mxu0 %v205_v5  ;;  %540 = vmatprep.subr.mxu1 %v205_v5  ;;  %v202_v8 = vld [vmem:[%s193_s11] sm:$0xff]  ;;  %v201_v16 = vld [vmem:[%s885_s1 + $0x38] sm:$0xff]  ;;  %v211_v17 = vld [vmem:[%s886_s2 + $0x28] sm:$0xff]  ;;  %s608_s10 = scalar_lea.vmem %s835_s6, 1024  ;;  %s687_s11 = smov [#allocation2]  }
  0x1a   : > { %521 = vmatpush3.msra.mxu0 %v205_v5  ;;  %544 = vmatpush3.msra.mxu1 %v205_v5  ;;  %v213_v19 = vld [vmem:[%s886_s2 + $0x38] sm:$0xff]  ;;  %v212_v20 = vld [vmem:[%s886_s2 + $0x30] sm:$0xff]  ;;  %p609_p12 = scmp.ne.s32.totalorder %s835_s6, %s608_s10  ;;  %s612_s18 = sshll.u32 %s687_s11, 4  ;;  %s613_s18 = int_to_ptr.vmem [resolvable:$false] %s612_s18 }
  0x1b   : > { %522 = vmatprep.subr.mxu0 %v204_v6  ;;  %541 = vmatprep.subr.mxu1 %v204_v6  ;;  %s614_s19 = scalar_lea.vmem %s613_s18, 2048  ;;  %p615_p1 = scmp.lt.s32.totalorder %s835_s6, %s613_s18 }
  0x1c   : > { %523 = vmatpush3.msra.mxu0 %v204_v6  ;;  %545 = vmatpush3.msra.mxu1 %v204_v6  ;;  %p610_p13 = pnand %p609_p12, %p750_p4  ;;  %p616_p2 = scmp.lt.s32.totalorder %s614_s19, %s608_s10 }
  0x1d   : > { %524 = vmatprep.subr.mxu0 %v203_v7  ;;  %542 = vmatprep.subr.mxu1 %v203_v7 }
  0x1e   : > { %525 = vmatpush3.msra.mxu0 %v203_v7  ;;  %546 = vmatpush3.msra.mxu1 %v203_v7  ;;  %p611_p0 = pneg %p610_p13  ;;  %p617_p3 = por %p616_p2, %p615_p1 }
  0x1f   : > { %526 = vmatprep.subr.mxu0 %v202_v8  ;;  %543 = vmatprep.subr.mxu1 %v202_v8 }
  0x20   : > { %527 = vmatpush3.msra.mxu0 %v202_v8  ;;  %547 = vmatpush3.msra.mxu1 %v202_v8  ;;  %p618_p5 = pnand %p617_p3, %p611_p0 }
  0x21   : > { %529 = vmatmul.mubr.msk.f32.vlgmr.msra.gmra.mxu0 %vm254_vm0, %v195_v9  ;;  %535 = vmatmul.mubr.msk.f32.vlgmr.msra.gmra.mxu1 %vm254_vm0, %v199_v10 }
  0x22   : > { %531 = vmatprep.mubr.msk.f32.mxu0 %vm254_vm0, %v196_v11  ;;  %537 = vmatprep.mubr.msk.f32.mxu1 %vm254_vm0, %v200_v12 }
  0x23   : > { %231 = vperm.xlu1 %607, %v209_v13   ;;  %221 = vperm.xlu0 %606, %v207_v14  }
  0x25   : > { %532 = vmatmul.mubr.msk.f32.gmra.mxu0 %vm254_vm0, %v197_v15  ;;  %538 = vmatmul.mubr.msk.f32.gmra.mxu1 %vm254_vm0, %v201_v16 }
  0x27   : > { %241 = vperm.xlu1 %607, %v211_v17   ;;  %236 = vperm.xlu0 %606, %v210_v18  }
  0x2b   : > { %251 = vperm.xlu1 %607, %v213_v19   ;;  %246 = vperm.xlu0 %606, %v212_v20  }
  0x92   : > { %v227_v21 = vpop.permute.xlu1 %226  ;;  %v217_v22 = vpop.permute.xlu0 %216 }
  0x9e   : > { %v232_v23 = vpop.permute.xlu1 %231  ;;  %v222_v24 = vpop.permute.xlu0 %221 }
  0xa2   : > { %v242_v25 = vpop.permute.xlu1 %241  ;;  %v237_v26 = vpop.permute.xlu0 %236 }
  0xa6   : > { %v252_v33 = vpop.permute.xlu1 %251  ;;  %v247_v38 = vpop.permute.xlu0 %246 }
  0xe1   : > { %v530_v27 = vpop.f32.mrf.mxu0  ;;  %v536_v28 = vpop.f32.mrf.mxu1 }
  0xe2   : > { %v351_v29 = vadd.f32 %v530_v27, %v222_v24  ;;  %v371_v30 = vadd.f32 %v536_v28, %v242_v25 }
  0xe3   : > { %v345_v31 = vpop.f32.mrf.mxu0  ;;  %v365_v32 = vpop.f32.mrf.mxu1 }
  0xe4   : > { %385 = vst [vmem:[%s185_s4 + $0x8] sm:$0xff] %v351_v29  ;;  %389 = vst [vmem:[%s185_s4 + $0x28] sm:$0xff] %v371_v30  ;;  %v346_v34 = vadd.f32 %v345_v31, %v217_v22  ;;  %v366_v35 = vadd.f32 %v365_v32, %v237_v26 }
  0xe5   : > { %v533_v36 = vpop.f32.mrf.mxu0  ;;  %v539_v37 = vpop.f32.mrf.mxu1 }
  0xe6   : > { %384 = vst [vmem:[%s185_s4] sm:$0xff] %v346_v34  ;;  %388 = vst [vmem:[%s185_s4 + $0x20] sm:$0xff] %v366_v35  ;;  %v361_v39 = vadd.f32 %v533_v36, %v232_v23  ;;  %v381_v40 = vadd.f32 %v539_v37, %v252_v33 }
  0xe7   : > { %v355_v41 = vpop.f32.mrf.mxu0  ;;  %v375_v42 = vpop.f32.mrf.mxu1 }
  0xe8   : > { %387 = vst [vmem:[%s185_s4 + $0x18] sm:$0xff] %v361_v39  ;;  %391 = vst [vmem:[%s185_s4 + $0x38] sm:$0xff] %v381_v40  ;;  %v356_v43 = vadd.f32 %v355_v41, %v227_v21  ;;  %v376_v44 = vadd.f32 %v375_v42, %v247_v38 }
  0xea   : > { %386 = vst [vmem:[%s185_s4 + $0x10] sm:$0xff] %v356_v43  ;;  %390 = vst [vmem:[%s185_s4 + $0x30] sm:$0xff] %v376_v44 }
  0xeb   : > { %621 = shalt.err (!%p618_p5)
}
  0xec   : > { %s622_s21 = scalar_lea.hbm %s833_s9, 1024  ;;  %s626_s27 = scalar_lea.hbm %s887_s3, 2048 }
  0xed   : > { %p623_p6 = scmp.ne.s32.totalorder %s833_s9, %s622_s21  ;;  %p627_p10 = scmp.lt.s32.totalorder %s833_s9, %s887_s3 }
  0xee   : > { %p628_p11 = scmp.lt.s32.totalorder %s626_s27, %s622_s21 }
  0xef   : > { %p624_p7 = pnand %p623_p6, %p750_p4 }
  0xf0   : > { %p629_p12 = por %p628_p11, %p627_p10 }
  0xf1   : > { %p625_p9 = pneg %p624_p7 }
  0xf3   : > { %p630_p13 = pnand %p629_p12, %p625_p9 }
  0xf5   : > { %633 = shalt.err (!%p630_p13)
}
  0xf6   : > { %s688_s30 = smov 128   ;;  %s689_s4 = smov 8  }
  0xf7   : > { %548 = dma.vmem_to_hbm [thread:$0]  (%p750_p4), %s835_s6, 1024, %s833_s9, %s839_s15, %s688_s30, %s688_s30, %s689_s4  }
  0xf8 PF: > { %p554_p0 = scmp.ge.s32.totalorder %s684_s17, 2  ;;  %s422_s5 = sand.u32 1, %s664_s12  }
  0xf9   : > { %s423_s7 = scalar_lea.sflag [#allocation3], %s422_s5 }
  0xfa   : > { %p551_p1 = pnand %p554_p0, %p757_p8 }
  0xfc   : > { %p552_p2 = pneg %p551_p1 }
  0xfe   : > { %659 = dma.done.wait (%p552_p2), %s423_s7, 1024  }
  0xff   : > { %661 = vsyncadd (%p552_p2), %s423_s7, 4294966272  ;;  %s16_s17 = sadd.s32 1, %s684_s17   ;;  %s890_s12 = smov %s668_s13 }
 0x100   : > { %p13_p3 = scmp.ge.s32.totalorder %s16_s17, 4   ;;  %s891_s13 = smov %s672_s14 }
 0x101   : > { %s892_s14 = smov %s763_s25  ;;  %s893_s15 = smov %s680_s16 }
 0x102   : > { %s894_s16 = smov %s896_s20  ;;  %15 = sbr.rel (!%p13_p3) target bundleno = 4 (0x4), region = 67 }
 0x107   :  { %428 = vsyncpa [#allocation3], 1 }
 0x108   :  { %430 = vsyncpa [#allocation3 + $0x1], 1 }

</bundles_post_ra>
